<compile_context>
chip_gen: v7x
topology: tpu7x:2x2x1
jax: 0.10.0
libtpu: 0.0.40
codegen_flags: <defaults>
</compile_context>

<pallas_src>
import functools

import jax
import jax.numpy as jnp
from jax.experimental import pallas as pl
from jax.experimental.pallas import tpu as pltpu


# Activations whose TPU lowering hits the EUP (for the cost estimate).
_TRANSCENDENTAL_ACTS = {"Tanh", "Sigmoid", "GELU", "SiLU", "ELU", "Softplus"}


def _apply_activation(y, name):
    """f32 elementwise activation, matching torch.nn defaults."""
    if name is None:
        return y
    if name == "ReLU":
        return jnp.maximum(y, 0.0)
    if name == "Tanh":
        return jnp.tanh(y)
    if name == "Sigmoid":
        return jax.nn.sigmoid(y)
    if name == "GELU":
        # torch.nn.GELU default is the exact erf form, not the tanh approximation.
        return jax.nn.gelu(y, approximate=False)
    if name == "LeakyReLU":
        return jnp.where(y > 0, y, 0.01 * y)
    if name == "SiLU":
        return y * jax.nn.sigmoid(y)
    if name == "ELU":
        return jnp.where(y > 0, y, jnp.expm1(y))
    if name == "Softplus":
        return jax.nn.softplus(y)
    # TODO(synk): extend mapping for other torch.nn activation names as needed.
    raise ValueError(f"Unsupported activation: {name}")


# ---------------------------------------------------------------------------
# Fused Pallas kernel: whole MLP for one batch tile.
#   refs = (x_ref, w_0, ..., w_{L-1}, b_pack_ref, o_ref)
# Each layer: z = (y_bf16 @ W_bf16) accumulated in f32 on the MXU, then
# f32 bias add + activation. Intermediates live in vregs/VMEM only.
# ---------------------------------------------------------------------------
def _mlp_kernel(*refs, n_layers, act_names):
    x_ref = refs[0]
    w_refs = refs[1:1 + n_layers]
    b_ref = refs[1 + n_layers]
    o_ref = refs[2 + n_layers]

    y = x_ref[...].astype(jnp.bfloat16)          # (tile_b, Fin) -> MXU input dtype
    b_all = b_ref[...]                           # (L, Fmax) f32, loaded once

    for i in range(n_layers):
        w = w_refs[i][...]                       # (Fin_i, Fout_i) bf16, resident
        fout = w.shape[1]
        z = jnp.dot(y, w, preferred_element_type=jnp.float32)   # f32 accumulation
        z = z + b_all[i:i + 1, :fout]            # static slice of packed biases
        z = _apply_activation(z, act_names[i])   # f32 elementwise
        if i + 1 < n_layers:
            y = z.astype(jnp.bfloat16)           # feed next matmul in bf16
        else:
            # TODO(synk): for a store-bound use case, pad the final Fout to a
            # multiple of 128 lanes for unmasked stores; skipped here (tiny output).
            o_ref[...] = z.astype(o_ref.dtype)


# ---------------------------------------------------------------------------
# Parameter construction / packing.
# ---------------------------------------------------------------------------
def init_rmnet_linear_params(key, in_features, neurons_order):
    """Deterministic init mimicking nn.Linear's U(-1/sqrt(fan_in), 1/sqrt(fan_in))."""
    params = []
    fan_ins = [in_features] + list(neurons_order[:-1])
    for fan_in, fan_out in zip(fan_ins, neurons_order):
        key, kw, kb = jax.random.split(key, 3)
        bound = 1.0 / jnp.sqrt(fan_in)
        w = jax.random.uniform(kw, (fan_in, fan_out), jnp.float32, -bound, bound)
        b = jax.random.uniform(kb, (1, fan_out), jnp.float32, -bound, bound)
        params.append((w, b))
    return params


def pack_rmnet_params(params):
    """bf16 weights (halves weight DMA bytes) + one packed f32 bias array."""
    w_list = tuple(w.astype(jnp.bfloat16) for (w, _) in params)
    fmax = max(w.shape[1] for (w, _) in params)
    b_pack = jnp.zeros((len(params), fmax), jnp.float32)
    for i, (_, b) in enumerate(params):
        b_pack = b_pack.at[i, : b.shape[1]].set(b[0])
    return w_list, b_pack


# ---------------------------------------------------------------------------
# Forward pass: one pallas_call for the whole network.
# ---------------------------------------------------------------------------
def rmnet_linear_forward(x, w_list, b_pack, activations_order, *, batch_tile=256):
    assert x.ndim == 2, "Must be flattened"
    B, Fin = x.shape
    n_layers = len(w_list)
    fout_last = int(w_list[-1].shape[1])
    # Layer 0 never gets an activation (torch loop starts at idx=1).
    act_names = (None,) + tuple(activations_order[1:])

    # Batch tiling: single tile if it fits, else 256-row tiles (pad B up).
    # (On v5e a 128-row tile fills its 128x128 MXUs; 256 is still correct.)
    if B <= batch_tile:
        tile_b, b_pad = B, B
    else:
        tile_b = batch_tile
        b_pad = pl.cdiv(B, tile_b) * tile_b
    x_p = x if b_pad == B else jnp.pad(x, ((0, b_pad - B), (0, 0)))
    grid = (b_pad // tile_b,)

    in_specs = [pl.BlockSpec((tile_b, Fin), lambda i: (i, 0))]
    for w in w_list:
        fi, fo = int(w.shape[0]), int(w.shape[1])
        # Constant index_map -> weight block stays resident across grid steps.
        in_specs.append(pl.BlockSpec((fi, fo), lambda i: (0, 0)))
    in_specs.append(pl.BlockSpec(b_pack.shape, lambda i: (0, 0)))
    out_spec = pl.BlockSpec((tile_b, fout_last), lambda i: (i, 0))

    # Advisory cost estimate so XLA can overlap this tiny kernel with neighbors.
    flops = 2 * b_pad * sum(int(w.shape[0]) * int(w.shape[1]) for w in w_list)
    transcendentals = sum(
        b_pad * int(w_list[i].shape[1])
        for i in range(n_layers)
        if act_names[i] in _TRANSCENDENTAL_ACTS
    )
    bytes_accessed = (
        b_pad * Fin * 4                                   # x (f32 in HBM)
        + sum(int(w.size) * 2 for w in w_list)            # bf16 weights
        + int(b_pack.size) * 4                            # packed biases
        + b_pad * fout_last * 4                           # output
    )

    kernel = functools.partial(_mlp_kernel, n_layers=n_layers, act_names=act_names)
    out = pl.pallas_call(
        kernel,
        out_shape=jax.ShapeDtypeStruct((b_pad, fout_last), jnp.float32),
        grid=grid,
        in_specs=in_specs,
        out_specs=out_spec,
        compiler_params=pltpu.CompilerParams(
            dimension_semantics=("parallel",),           # megacore sharding on v7x
        ),
        cost_estimate=pl.CostEstimate(
            flops=flops,
            transcendentals=transcendentals,
            bytes_accessed=bytes_accessed,
        ),
    )(x_p, *w_list, b_pack)

    return out[:B] if b_pad != B else out


# ---------------------------------------------------------------------------
# References (plain JAX) for the self-test.
# ---------------------------------------------------------------------------
def _ref_forward_f32(x, params, activations_order):
    act_names = [None] + list(activations_order[1:])
    y = x
    for i, (w, b) in enumerate(params):
        y = jnp.dot(y, w, precision=jax.lax.Precision.HIGHEST) + b
        y = _apply_activation(y, act_names[i])
    return y


def _ref_forward_bf16_emulated(x, params, activations_order):
    """Mimics the kernel's bf16-in / f32-accumulate numerics."""
    act_names = [None] + list(activations_order[1:])
    y = x.astype(jnp.bfloat16).astype(jnp.float32)
    for i, (w, b) in enumerate(params):
        wq = w.astype(jnp.bfloat16).astype(jnp.float32)
        y = jnp.dot(y, wq, precision=jax.lax.Precision.HIGHEST) + b
        y = _apply_activation(y, act_names[i])
        if i + 1 < len(params):
            y = y.astype(jnp.bfloat16).astype(jnp.float32)
    return y


if __name__ == "__main__":
    # Small config consistent with the module's constructor.
    in_features = 32
    neurons_order = [64, 64, 16]
    activations_order = [None, "ReLU", "Tanh"]
    batch = 8

    key = jax.random.PRNGKey(0)
    key, kx = jax.random.split(key)
    x = jax.random.normal(kx, (batch, in_features), jnp.float32)

    params = init_rmnet_linear_params(key, in_features, neurons_order)
    w_list, b_pack = pack_rmnet_params(params)

    out = rmnet_linear_forward(x, w_list, b_pack, activations_order)
    jax.block_until_ready(out)
    assert out.shape == (batch, neurons_order[-1])

    # Tight check vs. a reference that emulates bf16-in/f32-accumulate numerics.
    ref_bf16 = _ref_forward_bf16_emulated(x, params, activations_order)
    assert jnp.allclose(out, ref_bf16, atol=2e-3, rtol=2e-3), (
        jnp.max(jnp.abs(out - ref_bf16)))

    # Looser sanity check vs. a pure-f32 reference (bf16 MXU rounding tolerance).
    ref_f32 = _ref_forward_f32(x, params, activations_order)
    assert jnp.allclose(out, ref_f32, atol=5e-2, rtol=5e-2), (
        jnp.max(jnp.abs(out - ref_f32)))

    print("KERNEL_OK")
</pallas_src>

<mosaic_0001>
module attributes {stable_mosaic.version = 11 : i64} {
  func.func @_mlp_kernel(%arg0: i32, %arg1: memref<8x32xf32, #tpu.memory_space<vmem>>, %arg2: memref<32x64xbf16, #tpu.memory_space<vmem>>, %arg3: memref<64x64xbf16, #tpu.memory_space<vmem>>, %arg4: memref<64x16xbf16, #tpu.memory_space<vmem>>, %arg5: memref<3x64xf32, #tpu.memory_space<vmem>>, %arg6: memref<8x16xf32, #tpu.memory_space<vmem>>) attributes {dimension_semantics = [#tpu.dimension_semantics<parallel>], iteration_bounds = array<i64: 1>, scalar_prefetch = 0 : i64, scratch_operands = 0 : i64, tpu.core_type = #tpu.core_type<tc>, window_params = [{transform_indices = @transform_0, window_bounds = array<i64: 8, 32>}, {pipeline_mode = #tpu.pipeline_mode<synchronous>, transform_indices = @transform_1, window_bounds = array<i64: 32, 64>}, {pipeline_mode = #tpu.pipeline_mode<synchronous>, transform_indices = @transform_2, window_bounds = array<i64: 64, 64>}, {pipeline_mode = #tpu.pipeline_mode<synchronous>, transform_indices = @transform_3, window_bounds = array<i64: 64, 16>}, {pipeline_mode = #tpu.pipeline_mode<synchronous>, transform_indices = @transform_4, window_bounds = array<i64: 3, 64>}, {transform_indices = @transform_5, window_bounds = array<i64: 8, 16>}]} {
    %c0 = arith.constant 0 : index
    %c0_0 = arith.constant 0 : index
    %0 = vector.load %arg1[%c0, %c0_0] : memref<8x32xf32, #tpu.memory_space<vmem>>, vector<8x32xf32>
    %1 = arith.truncf %0 : vector<8x32xf32> to vector<8x32xbf16>
    %c0_1 = arith.constant 0 : index
    %c0_2 = arith.constant 0 : index
    %2 = vector.load %arg5[%c0_1, %c0_2] : memref<3x64xf32, #tpu.memory_space<vmem>>, vector<3x64xf32>
    %c0_3 = arith.constant 0 : index
    %c0_4 = arith.constant 0 : index
    %3 = vector.load %arg2[%c0_3, %c0_4] : memref<32x64xbf16, #tpu.memory_space<vmem>>, vector<32x64xbf16>
    %cst = arith.constant dense<0.000000e+00> : vector<8x64xf32>
    %4 = tpu.matmul %1, %3, %cst {dimension_numbers = #tpu.dot_dimension_numbers<[1], [0], [0], [1], [0, 0, 1, 1], [], []>} : vector<8x32xbf16>, vector<32x64xbf16>, vector<8x64xf32> -> vector<8x64xf32>
    %5 = vector.extract_strided_slice %2 {offsets = [0, 0], sizes = [1, 64], strides = [1, 1]} : vector<3x64xf32> to vector<1x64xf32>
    %6 = vector.broadcast %5 : vector<1x64xf32> to vector<8x64xf32>
    %7 = arith.addf %4, %6 : vector<8x64xf32>
    %8 = arith.truncf %7 : vector<8x64xf32> to vector<8x64xbf16>
    %c0_5 = arith.constant 0 : index
    %c0_6 = arith.constant 0 : index
    %9 = vector.load %arg3[%c0_5, %c0_6] : memref<64x64xbf16, #tpu.memory_space<vmem>>, vector<64x64xbf16>
    %cst_7 = arith.constant dense<0.000000e+00> : vector<8x64xf32>
    %10 = tpu.matmul %8, %9, %cst_7 {dimension_numbers = #tpu.dot_dimension_numbers<[1], [0], [0], [1], [0, 0, 1, 1], [], []>} : vector<8x64xbf16>, vector<64x64xbf16>, vector<8x64xf32> -> vector<8x64xf32>
    %11 = vector.extract_strided_slice %2 {offsets = [1, 0], sizes = [1, 64], strides = [1, 1]} : vector<3x64xf32> to vector<1x64xf32>
    %12 = vector.broadcast %11 : vector<1x64xf32> to vector<8x64xf32>
    %13 = arith.addf %10, %12 : vector<8x64xf32>
    %cst_8 = arith.constant 0.000000e+00 : f32
    %14 = vector.broadcast %cst_8 : f32 to vector<8x64xf32>
    %15 = arith.maximumf %13, %14 : vector<8x64xf32>
    %16 = arith.truncf %15 : vector<8x64xf32> to vector<8x64xbf16>
    %c0_9 = arith.constant 0 : index
    %c0_10 = arith.constant 0 : index
    %17 = vector.load %arg4[%c0_9, %c0_10] : memref<64x16xbf16, #tpu.memory_space<vmem>>, vector<64x16xbf16>
    %cst_11 = arith.constant dense<0.000000e+00> : vector<8x16xf32>
    %18 = tpu.matmul %16, %17, %cst_11 {dimension_numbers = #tpu.dot_dimension_numbers<[1], [0], [0], [1], [0, 0, 1, 1], [], []>} : vector<8x64xbf16>, vector<64x16xbf16>, vector<8x16xf32> -> vector<8x16xf32>
    %19 = vector.extract_strided_slice %2 {offsets = [2, 0], sizes = [1, 16], strides = [1, 1]} : vector<3x64xf32> to vector<1x16xf32>
    %20 = vector.broadcast %19 : vector<1x16xf32> to vector<8x16xf32>
    %21 = arith.addf %18, %20 : vector<8x16xf32>
    %22 = math.tanh %21 : vector<8x16xf32>
    %c0_12 = arith.constant 0 : index
    %c0_13 = arith.constant 0 : index
    %23 = vector.load %arg6[%c0_12, %c0_13] : memref<8x16xf32, #tpu.memory_space<vmem>>, vector<8x16xf32>
    tpu.vector_store %arg6[%c0_12, %c0_13], %22 {strides = array<i32>} : memref<8x16xf32, #tpu.memory_space<vmem>>, vector<8x16xf32>,
    return
  }
  func.func @transform_0(%arg0: i32) -> (i32, i32) {
    %c0_i32 = arith.constant 0 : i32
    %c0_i32_0 = arith.constant 0 : i32
    return %arg0, %c0_i32 : i32, i32
  }
  func.func @transform_1(%arg0: i32) -> (i32, i32) {
    %c0_i32 = arith.constant 0 : i32
    %c0_i32_0 = arith.constant 0 : i32
    %c0_i32_1 = arith.constant 0 : i32
    return %c0_i32, %c0_i32_0 : i32, i32
  }
  func.func @transform_2(%arg0: i32) -> (i32, i32) {
    %c0_i32 = arith.constant 0 : i32
    %c0_i32_0 = arith.constant 0 : i32
    %c0_i32_1 = arith.constant 0 : i32
    return %c0_i32, %c0_i32_0 : i32, i32
  }
  func.func @transform_3(%arg0: i32) -> (i32, i32) {
    %c0_i32 = arith.constant 0 : i32
    %c0_i32_0 = arith.constant 0 : i32
    %c0_i32_1 = arith.constant 0 : i32
    return %c0_i32, %c0_i32_0 : i32, i32
  }
  func.func @transform_4(%arg0: i32) -> (i32, i32) {
    %c0_i32 = arith.constant 0 : i32
    %c0_i32_0 = arith.constant 0 : i32
    %c0_i32_1 = arith.constant 0 : i32
    return %c0_i32, %c0_i32_0 : i32, i32
  }
  func.func @transform_5(%arg0: i32) -> (i32, i32) {
    %c0_i32 = arith.constant 0 : i32
    %c0_i32_0 = arith.constant 0 : i32
    return %arg0, %c0_i32 : i32, i32
  }
}

</mosaic_0001>

<bundles_post_ra>
// kernel: tpu_custom_call.1
= control target key start
LH: loop header
LB: loop body
LE: loop exit
PB: predicated region body
PF: predicated region fallthrough
CT: control target
= control target key end

     0   :  { %10 = vsyncpa [#allocation3], 0  ;;  %s502_s0 = inlined_call_operand.vmem [shape: f32[8,32], index: 0, kind: input, shape index: {}]   ;;  %s503_s1 = inlined_call_operand.hbm [shape: bf16[32,64], index: 1, kind: input, shape index: {}]   ;;  %s504_s2 = inlined_call_operand.vmem [shape: bf16[64,64], index: 2, kind: input, shape index: {}]   ;;  %s505_s3 = inlined_call_operand.vmem [shape: bf16[64,16], index: 3, kind: input, shape index: {}]   ;;  %s506_s4 = inlined_call_operand.vmem [shape: f32[3,64], index: 4, kind: input, shape index: {}]   ;;  %s507_s5 = inlined_call_operand.hbm [shape: f32[8,16], index: 5, kind: output, shape index: {}]  }
   0x1   :  { %11 = vsyncpa [#allocation4], 0  ;;  %s407_s18 = smov [#allocation2]   ;;  %s359_s22 = scalar_lea.hbm %s503_s1, 256 }
   0x2   :  { %s19_s19 = sshll.u32 %s407_s18, 4  ;;  %p360_p0 = scmp.ne.s32.totalorder %s503_s1, %s359_s22  ;;  %s20_s19 = int_to_ptr.vmem [resolvable:$true] %s19_s19 }
   0x3   :  { %p363_p1 = scmp.lt.u32.totalorder %s359_s22, %s503_s1 }
   0x5   :  { %p365_p2 = pnand %p363_p1, %p360_p0 }
   0x7   :  { %368 = shalt.err (!%p365_p2)
}
   0x8   :  { %s369_s27 = scalar_lea.vmem %s20_s19, 256  ;;  %p374_p4 = scmp.lt.s32.totalorder %s20_s19, %s20_s19 }
   0x9   :  { %p370_p3 = scmp.ne.s32.totalorder %s20_s19, %s369_s27  ;;  %p375_p5 = scmp.lt.s32.totalorder %s369_s27, %s369_s27 }
   0xb   :  { %p376_p6 = por %p375_p5, %p374_p4 }
   0xd   :  { %p377_p7 = pnand %p376_p6, %p370_p3 }
   0xf   :  { %380 = shalt.err (!%p377_p7)
}
  0x10   :  { %s408_s28 = smov 64   ;;  %s409_s29 = smov 4  }
  0x11   :  { %25 = dma.hbm_to_vmem [thread:$0]  %s503_s1, 256, %s20_s19, [#allocation3], %s408_s28, %s408_s28, %s409_s29  }
  0x12   :  { %403 = dma.done.wait [#allocation3], 256  }
  0x13   :  { %404 = vsyncadd [#allocation3], 4294967040  ;;  %v410_v0 = vmov 0.0   ;;  %vm411_vm0 = vmmov 0   ;;  %v347_v1 = vld [vmem:[#allocation2] sm:$0xff]   ;;  %v348_v2 = vld [vmem:[#allocation2 + $0x8] sm:$0xff]   ;;  %v43_v11 = vlaneseq }
  0x14   :  { %309 = vmatprep.subr.bf16.mxu0 %v410_v0  ;;  %313 = vmatprep.mubr.msk.bf16.mxu0 %vm411_vm0, %v410_v0  ;;  %v36_v3 = vld [vmem:[%s502_s0] sm:$0xff]  ;;  %vm59_vm1 = vcmask 261120   ;;  %v350_v6 = vld [vmem:[%s504_s2 + $0x8] sm:$0xff]   ;;  %v351_v7 = vld [vmem:[%s504_s2 + $0x10] sm:$0xff]   ;;  %vm140_vm2 = vcmask 523264   ;;  %vm266_vm3 = vcmask 130048  }
  0x15   :  { %317 = vmatprep.subr.bf16.mxu1 %v410_v0  ;;  %325 = vmatprep.mubr.msk.bf16.mxu1 %vm411_vm0, %v410_v0  ;;  %v349_v4 = vld [vmem:[%s504_s2] sm:$0xff]   ;;  %v37_v5 = vpack.c.bf16 %v36_v3, %v36_v3  ;;  %v352_v8 = vld [vmem:[%s504_s2 + $0x18] sm:$0xff]   ;;  %v354_v10 = vld [vmem:[%s505_s3 + $0x8] sm:$0xff]   ;;  %v44_v12 = vshrl.u32 %v43_v11, 7 }
  0x16   :  { %310 = vmatpush3.bf16.msra.mxu0 %v347_v1  ;;  %318 = vmatpush3.bf16.msra.mxu1 %v349_v4  ;;  %v353_v9 = vld [vmem:[%s505_s3] sm:$0xff]   ;;  %v355_v22 = vld [vmem:[%s505_s3 + $0x10] sm:$0xff]   ;;  %v356_v23 = vld [vmem:[%s505_s3 + $0x18] sm:$0xff]   ;;  %s412_s3 = smov [#allocation5]  }
  0x17   :  { %311 = vmatprep.subr.bf16.mxu0 %v410_v0  ;;  %319 = vmatprep.subr.bf16.mxu1 %v410_v0  ;;  %v45_v13 = vsub.s32 0, %v44_v12  ;;  %v38_v14 = vld [vmem:[%s506_s4] sm:$0x7]  ;;  %v114_v24 = vsub.s32 1, %v44_v12  ;;  %v196_v33 = vsub.s32 2, %v44_v12  ;;  %s274_s4 = sshll.u32 %s412_s3, 4  ;;  %s275_s4 = int_to_ptr.vmem [resolvable:$true] %s274_s4 }
  0x18   :  { %s381_s24 = scalar_lea.vmem %s275_s4, 128  ;;  %p386_p9 = scmp.lt.s32.totalorder %s275_s4, %s275_s4 }
  0x19   :  { %v46_v15 = vrot.slane %v38_v14, %v45_v13  ;;  %v115_v25 = vrot.slane %v38_v14, %v114_v24  ;;  %v197_v34 = vrot.slane %v38_v14, %v196_v33  ;;  %p382_p8 = scmp.ne.s32.totalorder %s275_s4, %s381_s24  ;;  %p387_p10 = scmp.lt.s32.totalorder %s381_s24, %s381_s24 }
  0x1a   :  { %312 = vmatpush3.bf16.msra.mxu0 %v348_v2  ;;  %320 = vmatpush3.bf16.msra.mxu1 %v350_v6 }
  0x1b   :  { %329 = vmatprep.subr.bf16.mxu0 %v410_v0  ;;  %321 = vmatprep.subr.bf16.mxu1 %v410_v0  ;;  %p388_p11 = por %p387_p10, %p386_p9 }
  0x1d   :  { %314 = vmatmul.mubr.msk.bf16.vlgmr.msra.gmra.mrb[0].mxu0 %vm59_vm1, %v37_v5  ;;  %p389_p12 = pnand %p388_p11, %p382_p8 }
  0x1e   :  { %337 = vmatprep.mubr.msk.bf16.mxu0 %vm411_vm0, %v410_v0  ;;  %322 = vmatpush3.bf16.msra.mxu1 %v351_v7 }
  0x1f   :  { %323 = vmatprep.subr.bf16.mxu1 %v410_v0  ;;  %330 = vmatpush3.bf16.msra.mxu0 %v353_v9 }
  0x20   :  { %331 = vmatprep.subr.bf16.mxu0 %v410_v0 }
  0x22   :  { %324 = vmatpush3.bf16.msra.mxu1 %v352_v8 }
  0x23   :  { %332 = vmatpush3.bf16.msra.mxu0 %v354_v10 }
  0x24   :  { %333 = vmatprep.subr.bf16.mxu0 %v410_v0 }
  0x27   :  { %334 = vmatpush3.bf16.msra.mxu0 %v355_v22 }
  0x28   :  { %335 = vmatprep.subr.bf16.mxu0 %v410_v0 }
  0x2b   :  { %336 = vmatpush3.bf16.msra.mxu0 %v356_v23 }
  0xf0   :  { %v97_v16 = vpop.f32.mrb[0].mxu0 }
  0xf1   :  { %v98_v17 = vadd.f32 %v97_v16, %v46_v15  ;;  %v315_v18 = vpop.f32.mrb[1].mxu0 }
  0xf2   :  { %v100_v19 = vpop.f32.mrb[2].mxu0 }
  0xf3   :  { %v103_v20 = vpack.c.bf16 %v98_v17, %v98_v17  ;;  %v316_v21 = vpop.f32.mrb[3].mxu0 }
  0xf5   :  { %326 = vmatmul.mubr.msk.bf16.vlgmr.msra.gmra.mrb[0].mxu1 %vm140_vm2, %v103_v20 }
 0x1c8   :  { %v178_v26 = vpop.f32.mrb[0].mxu1 }
 0x1c9   :  { %v179_v27 = vadd.f32 %v178_v26, %v115_v25  ;;  %v327_v28 = vpop.f32.mrb[1].mxu1 }
 0x1ca   :  { %v181_v29 = vpop.f32.mrb[2].mxu1 }
 0x1cb   :  { %v184_v30 = vmax.f32 %v179_v27, 0.0  ;;  %v328_v31 = vpop.f32.mrb[3].mxu1 }
 0x1cd   :  { %v185_v32 = vpack.c.bf16 %v184_v30, %v184_v30 }
 0x1cf   :  { %338 = vmatmul.mubr.msk.bf16.vlgmr.msra.gmra.mrb[4].mxu0 %vm140_vm2, %v185_v32 }
 0x2a2   :  { %v259_v35 = vpop.f32.mrb[4].mxu0 }
 0x2a3   :  { %v260_v36 = vadd.f32 %v259_v35, %v197_v34  ;;  %v339_v37 = vpop.f32.mrb[5].mxu0 }
 0x2a4   :  { %v262_v38 = vpop.f32.mrb[6].mxu0 }
 0x2a5   :  { %357 = vtanh.f32 %v260_v36  ;;  %v340_v39 = vpop.f32.mrb[7].mxu0 }
 0x2af   :  { %v358_v40 = vpop.eup %357 }
 0x2b0   :  { %267 = vst.msk [vmem:[#allocation5] sm:$0xff] %vm266_vm3, %v358_v40 }
 0x2b1   :  { %392 = shalt.err (!%p389_p12)
}
 0x2b2   :  { %s393_s27 = scalar_lea.hbm %s507_s5, 128 }
 0x2b3   :  { %p394_p13 = scmp.ne.s32.totalorder %s507_s5, %s393_s27  ;;  %p397_p0 = scmp.lt.u32.totalorder %s393_s27, %s507_s5 }
 0x2b5   :  { %p399_p1 = pnand %p397_p0, %p394_p13 }
 0x2b7   :  { %402 = shalt.err (!%p399_p1)
}
 0x2b8   :  { %277 = dma.vmem_to_hbm [thread:$0]  %s275_s4, 128, %s507_s5, [#allocation4]  }
 0x2b9   :  { %405 = dma.done.wait [#allocation4], 128  }
 0x2ba   :  { %406 = vsyncadd [#allocation4], 4294967168 }
 0x2bb   :  { %281 = vsyncpa [#allocation3], 1 }
 0x2bc   :  { %282 = vsyncpa [#allocation4], 1 }

</bundles_post_ra>
